<compile_context>
chip_gen: v7x
topology: tpu7x:2x2x1
jax: 0.10.0
libtpu: 0.0.40
codegen_flags: <defaults>
</compile_context>

<pallas_src>
import functools

import jax
import jax.numpy as jnp
from jax import lax
from jax.experimental import pallas as pl
from jax.experimental.pallas import tpu as pltpu


def _chamfer_kernel(x_ref, y_ref, o_ref, row_acc, col_acc, sumx, sumy,
                    *, n_total, m_total, n_tiles, m_tiles):
    # x_ref: (BT, TN, 3)   points on sublanes, coords on (padded) lanes
    # y_ref: (BT, 3, TM)   coords on sublanes, points lane-dense
    # o_ref: (BT, 1, 128)
    ni = pl.program_id(1)
    mi = pl.program_id(2)

    # Zero running sums at the first (N, M) tile of this batch group.
    @pl.when(jnp.logical_and(ni == 0, mi == 0))
    def _():
        sumx[...] = jnp.zeros_like(sumx)
        sumy[...] = jnp.zeros_like(sumy)

    x = x_ref[...]                                   # (BT, TN, 3)
    y = y_ref[...]                                   # (BT, 3, TM)

    # Pairwise squared distances, pure-VPU FMA-style accumulation.
    d = (x[:, :, 0:1] - y[:, 0:1, :]) ** 2
    d = d + (x[:, :, 1:2] - y[:, 1:2, :]) ** 2
    d = d + (x[:, :, 2:3] - y[:, 2:3, :]) ** 2       # (BT, TN, TM)

    # ---- row direction: min over M, streamed across M tiles (elementwise) ----
    @pl.when(mi == 0)
    def _():
        row_acc[...] = d

    @pl.when(mi != 0)
    def _():
        row_acc[...] = jnp.minimum(row_acc[...], d)

    # ---- col direction: min over N, streamed across N tiles (elementwise) ----
    # col_acc has shape (m_tiles, BT, TN, TM); indexing the leading dim keeps
    # the dynamic index off the lane axis.
    @pl.when(ni == 0)
    def _():
        col_acc[mi] = d

    @pl.when(ni != 0)
    def _():
        col_acc[mi] = jnp.minimum(col_acc[mi], d)

    # ---- finalize row mins once per N tile (single cross-lane reduce) ----
    @pl.when(mi == m_tiles - 1)
    def _():
        rm = jnp.min(row_acc[...], axis=2, keepdims=True)       # (BT, TN, 1)
        sumx[...] = sumx[...] + jnp.sum(rm, axis=1, keepdims=True)

    # ---- finalize col mins once per M tile, only on the last N tile ----
    @pl.when(ni == n_tiles - 1)
    def _():
        cm = jnp.min(col_acc[mi], axis=1, keepdims=True)        # (BT, 1, TM)
        sumy[...] = sumy[...] + jnp.sum(cm, axis=2, keepdims=True)

    # ---- write per-cloud means into lanes 0 / 1 of the output row ----
    @pl.when(jnp.logical_and(ni == n_tiles - 1, mi == m_tiles - 1))
    def _():
        cham_x = sumx[...] * (1.0 / n_total)        # (BT, 1, 128), lanes equal
        cham_y = sumy[...] * (1.0 / m_total)
        lane = lax.broadcasted_iota(jnp.int32, cham_x.shape, 2)
        o_ref[...] = jnp.where(lane == 0, cham_x,
                               jnp.where(lane == 1, cham_y, 0.0))


def _largest_divisor_leq(n, cap):
    cap = max(1, min(n, cap))
    for d in range(cap, 0, -1):
        if n % d == 0:
            return d
    return 1


def _pick_tile(dim, align, cap):
    """Largest tile that divides `dim`, is a multiple of `align`, and <= cap.
    Falls back to the full dim (block == full array dim is always legal)."""
    if dim <= cap:
        return dim
    t = (cap // align) * align
    while t >= align:
        if dim % t == 0:
            return t
        t -= align
    # TODO(synk): add +inf / mask-padding for awkward N, M so a divisor-free
    # dim does not force a single full-size tile (and huge col-min scratch).
    return dim


def chamfer_loss(x, y, weights=None):
    """x: (B, N, 3), y: (B, M, 3) -> scalar chamfer loss (sum of both means).

    `weights` is accepted and ignored, matching the PyTorch module's forward().
    """
    del weights
    x = x.astype(jnp.float32)
    y = y.astype(jnp.float32)
    B, N, _ = x.shape
    _, M, _ = y.shape

    # Lane-dense layout for y: points on the 128-lane axis.
    y_t = jnp.transpose(y, (0, 2, 1))                # (B, 3, M)

    TM = _pick_tile(M, 128, 1024)                    # lane-axis tile over M
    TN = _pick_tile(N, 8, 256)                       # sublane-axis tile over N

    # Batch several clouds per grid step to amortize per-step overhead, bounded
    # so streaming-min scratch stays well inside scoped VMEM (v7x-safe), and
    # keeping >=2 batch groups when B >= 4 so megacore still has a parallel axis.
    per_batch_scratch = (TN * TM + TN * M + 2 * 128) * 4
    bt_cap = max(1, min(8, (8 * 1024 * 1024) // max(per_batch_scratch, 1)))
    if B >= 4:
        bt_cap = min(bt_cap, B // 2)
    BT = _largest_divisor_leq(B, bt_cap)

    grid = (B // BT, N // TN, M // TM)
    n_tiles, m_tiles = grid[1], grid[2]

    kernel = functools.partial(
        _chamfer_kernel,
        n_total=N, m_total=M, n_tiles=n_tiles, m_tiles=m_tiles)

    per_batch = pl.pallas_call(
        kernel,
        out_shape=jax.ShapeDtypeStruct((B, 1, 128), jnp.float32),
        grid_spec=pltpu.PrefetchScalarGridSpec(
            num_scalar_prefetch=0,
            grid=grid,
            in_specs=[
                pl.BlockSpec((BT, TN, 3), lambda b, n, m: (b, n, 0)),
                pl.BlockSpec((BT, 3, TM), lambda b, n, m: (b, 0, m)),
            ],
            out_specs=pl.BlockSpec((BT, 1, 128), lambda b, n, m: (b, 0, 0)),
            scratch_shapes=[
                pltpu.VMEM((BT, TN, TM), jnp.float32),        # row-min stream
                pltpu.VMEM((m_tiles, BT, TN, TM), jnp.float32),  # col-min stream
                pltpu.VMEM((BT, 1, 128), jnp.float32),        # sum of row mins
                pltpu.VMEM((BT, 1, 128), jnp.float32),        # sum of col mins
            ],
        ),
        compiler_params=pltpu.CompilerParams(
            dimension_semantics=("parallel", "arbitrary", "arbitrary"),
        ),
    )(x, y_t)

    cham_x = per_batch[:, 0, 0]   # (B,)  mean_i min_j ||x_i - y_j||^2
    cham_y = per_batch[:, 0, 1]   # (B,)  mean_j min_i ||x_i - y_j||^2
    # pytorch3d default: batch mean of each term, then summed.
    return jnp.mean(cham_x) + jnp.mean(cham_y)


def _chamfer_ref(x, y):
    d = jnp.sum((x[:, :, None, :] - y[:, None, :, :]) ** 2, axis=-1)  # (B,N,M)
    cham_x = jnp.mean(jnp.min(d, axis=2), axis=1)                     # (B,)
    cham_y = jnp.mean(jnp.min(d, axis=1), axis=1)                     # (B,)
    return jnp.mean(cham_x) + jnp.mean(cham_y)


if __name__ == "__main__":
    key = jax.random.PRNGKey(0)
    kx, ky = jax.random.split(key)
    B, N, M = 2, 128, 128
    x = jax.random.normal(kx, (B, N, 3), dtype=jnp.float32)
    y = jax.random.normal(ky, (B, M, 3), dtype=jnp.float32) * 0.8 + 0.1

    loss = chamfer_loss(x, y)
    loss = jax.block_until_ready(loss)

    ref = _chamfer_ref(x, y)
    assert jnp.allclose(loss, ref, rtol=1e-4, atol=1e-5), (loss, ref)

    print("KERNEL_OK")
</pallas_src>

<mosaic_0001>
module attributes {stable_mosaic.version = 11 : i64} {
  func.func @_chamfer_kernel(%arg0: i32, %arg1: i32, %arg2: i32, %arg3: memref<2x128x3xf32, #tpu.memory_space<vmem>>, %arg4: memref<2x3x128xf32, #tpu.memory_space<vmem>>, %arg5: memref<2x1x128xf32, #tpu.memory_space<vmem>>, %arg6: memref<2x128x128xf32, #tpu.memory_space<vmem>>, %arg7: memref<1x2x128x128xf32, #tpu.memory_space<vmem>>, %arg8: memref<2x1x128xf32, #tpu.memory_space<vmem>>, %arg9: memref<2x1x128xf32, #tpu.memory_space<vmem>>) attributes {dimension_semantics = [#tpu.dimension_semantics<parallel>, #tpu.dimension_semantics<arbitrary>, #tpu.dimension_semantics<arbitrary>], iteration_bounds = array<i64: 1, 1, 1>, scalar_prefetch = 0 : i64, scratch_operands = 4 : i64, tpu.core_type = #tpu.core_type<tc>, window_params = [{transform_indices = @transform_0, window_bounds = array<i64: 2, 128, 3>}, {transform_indices = @transform_1, window_bounds = array<i64: 2, 3, 128>}, {transform_indices = @transform_2, window_bounds = array<i64: 2, 1, 128>}]} {
    %c0_i32 = arith.constant 0 : i32
    %0 = arith.cmpi eq, %arg1, %c0_i32 : i32
    %c0_i32_0 = arith.constant 0 : i32
    %1 = arith.cmpi eq, %arg2, %c0_i32_0 : i32
    %2 = arith.andi %0, %1 : i1
    %3 = arith.extui %2 : i1 to i32
    %c0_i32_1 = arith.constant 0 : i32
    %4 = arith.cmpi ne, %3, %c0_i32_1 : i32
    scf.if %4 {
      %cst = arith.constant 0.000000e+00 : f32
      %50 = vector.broadcast %cst : f32 to vector<2x1x128xf32>
      %c0_22 = arith.constant 0 : index
      %c0_23 = arith.constant 0 : index
      %c0_24 = arith.constant 0 : index
      %51 = vector.load %arg8[%c0_22, %c0_23, %c0_24] : memref<2x1x128xf32, #tpu.memory_space<vmem>>, vector<2x1x128xf32>
      tpu.vector_store %arg8[%c0_22, %c0_23, %c0_24], %50 {strides = array<i32>} : memref<2x1x128xf32, #tpu.memory_space<vmem>>, vector<2x1x128xf32>,
      %cst_25 = arith.constant 0.000000e+00 : f32
      %52 = vector.broadcast %cst_25 : f32 to vector<2x1x128xf32>
      %c0_26 = arith.constant 0 : index
      %c0_27 = arith.constant 0 : index
      %c0_28 = arith.constant 0 : index
      %53 = vector.load %arg9[%c0_26, %c0_27, %c0_28] : memref<2x1x128xf32, #tpu.memory_space<vmem>>, vector<2x1x128xf32>
      tpu.vector_store %arg9[%c0_26, %c0_27, %c0_28], %52 {strides = array<i32>} : memref<2x1x128xf32, #tpu.memory_space<vmem>>, vector<2x1x128xf32>,
    } else {
    }
    %c0 = arith.constant 0 : index
    %c0_2 = arith.constant 0 : index
    %c0_3 = arith.constant 0 : index
    %5 = vector.load %arg3[%c0, %c0_2, %c0_3] : memref<2x128x3xf32, #tpu.memory_space<vmem>>, vector<2x128x3xf32>
    %c0_4 = arith.constant 0 : index
    %c0_5 = arith.constant 0 : index
    %c0_6 = arith.constant 0 : index
    %6 = vector.load %arg4[%c0_4, %c0_5, %c0_6] : memref<2x3x128xf32, #tpu.memory_space<vmem>>, vector<2x3x128xf32>
    %7 = vector.extract_strided_slice %5 {offsets = [0, 0, 0], sizes = [2, 128, 1], strides = [1, 1, 1]} : vector<2x128x3xf32> to vector<2x128x1xf32>
    %8 = vector.extract_strided_slice %6 {offsets = [0, 0, 0], sizes = [2, 1, 128], strides = [1, 1, 1]} : vector<2x3x128xf32> to vector<2x1x128xf32>
    %9 = vector.broadcast %7 : vector<2x128x1xf32> to vector<2x128x128xf32>
    %10 = vector.broadcast %8 : vector<2x1x128xf32> to vector<2x128x128xf32>
    %11 = arith.subf %9, %10 : vector<2x128x128xf32>
    %12 = arith.mulf %11, %11 : vector<2x128x128xf32>
    %13 = vector.extract_strided_slice %5 {offsets = [0, 0, 1], sizes = [2, 128, 1], strides = [1, 1, 1]} : vector<2x128x3xf32> to vector<2x128x1xf32>
    %14 = vector.extract_strided_slice %6 {offsets = [0, 1, 0], sizes = [2, 1, 128], strides = [1, 1, 1]} : vector<2x3x128xf32> to vector<2x1x128xf32>
    %15 = vector.broadcast %13 : vector<2x128x1xf32> to vector<2x128x128xf32>
    %16 = vector.broadcast %14 : vector<2x1x128xf32> to vector<2x128x128xf32>
    %17 = arith.subf %15, %16 : vector<2x128x128xf32>
    %18 = arith.mulf %17, %17 : vector<2x128x128xf32>
    %19 = arith.addf %12, %18 : vector<2x128x128xf32>
    %20 = vector.extract_strided_slice %5 {offsets = [0, 0, 2], sizes = [2, 128, 1], strides = [1, 1, 1]} : vector<2x128x3xf32> to vector<2x128x1xf32>
    %21 = vector.extract_strided_slice %6 {offsets = [0, 2, 0], sizes = [2, 1, 128], strides = [1, 1, 1]} : vector<2x3x128xf32> to vector<2x1x128xf32>
    %22 = vector.broadcast %20 : vector<2x128x1xf32> to vector<2x128x128xf32>
    %23 = vector.broadcast %21 : vector<2x1x128xf32> to vector<2x128x128xf32>
    %24 = arith.subf %22, %23 : vector<2x128x128xf32>
    %25 = arith.mulf %24, %24 : vector<2x128x128xf32>
    %26 = arith.addf %19, %25 : vector<2x128x128xf32>
    %c0_i32_7 = arith.constant 0 : i32
    %27 = arith.cmpi eq, %arg2, %c0_i32_7 : i32
    %28 = arith.extui %27 : i1 to i32
    %c0_i32_8 = arith.constant 0 : i32
    %29 = arith.cmpi ne, %28, %c0_i32_8 : i32
    scf.if %29 {
      %c0_22 = arith.constant 0 : index
      %c0_23 = arith.constant 0 : index
      %c0_24 = arith.constant 0 : index
      %50 = vector.load %arg6[%c0_22, %c0_23, %c0_24] : memref<2x128x128xf32, #tpu.memory_space<vmem>>, vector<2x128x128xf32>
      tpu.vector_store %arg6[%c0_22, %c0_23, %c0_24], %26 {strides = array<i32>} : memref<2x128x128xf32, #tpu.memory_space<vmem>>, vector<2x128x128xf32>,
    } else {
    }
    %c0_i32_9 = arith.constant 0 : i32
    %30 = arith.cmpi ne, %arg2, %c0_i32_9 : i32
    %31 = arith.extui %30 : i1 to i32
    %c0_i32_10 = arith.constant 0 : i32
    %32 = arith.cmpi ne, %31, %c0_i32_10 : i32
    scf.if %32 {
      %c0_22 = arith.constant 0 : index
      %c0_23 = arith.constant 0 : index
      %c0_24 = arith.constant 0 : index
      %50 = vector.load %arg6[%c0_22, %c0_23, %c0_24] : memref<2x128x128xf32, #tpu.memory_space<vmem>>, vector<2x128x128xf32>
      %51 = arith.minimumf %50, %26 : vector<2x128x128xf32>
      %c0_25 = arith.constant 0 : index
      %c0_26 = arith.constant 0 : index
      %c0_27 = arith.constant 0 : index
      %52 = vector.load %arg6[%c0_25, %c0_26, %c0_27] : memref<2x128x128xf32, #tpu.memory_space<vmem>>, vector<2x128x128xf32>
      tpu.vector_store %arg6[%c0_25, %c0_26, %c0_27], %51 {strides = array<i32>} : memref<2x128x128xf32, #tpu.memory_space<vmem>>, vector<2x128x128xf32>,
    } else {
    }
    %c0_i32_11 = arith.constant 0 : i32
    %33 = arith.cmpi eq, %arg1, %c0_i32_11 : i32
    %34 = arith.extui %33 : i1 to i32
    %c0_i32_12 = arith.constant 0 : i32
    %35 = arith.cmpi ne, %34, %c0_i32_12 : i32
    scf.if %35 {
      %50 = arith.index_cast %arg2 : i32 to index
      %c0_22 = arith.constant 0 : index
      %c0_23 = arith.constant 0 : index
      %c0_24 = arith.constant 0 : index
      %51 = vector.load %arg7[%50, %c0_22, %c0_23, %c0_24] : memref<1x2x128x128xf32, #tpu.memory_space<vmem>>, vector<1x2x128x128xf32>
      %52 = vector.shape_cast %51 : vector<1x2x128x128xf32> to vector<2x128x128xf32>
      %53 = vector.shape_cast %26 : vector<2x128x128xf32> to vector<1x2x128x128xf32>
      tpu.vector_store %arg7[%50, %c0_22, %c0_23, %c0_24], %53 {strides = array<i32>} : memref<1x2x128x128xf32, #tpu.memory_space<vmem>>, vector<1x2x128x128xf32>,
    } else {
    }
    %c0_i32_13 = arith.constant 0 : i32
    %36 = arith.cmpi ne, %arg1, %c0_i32_13 : i32
    %37 = arith.extui %36 : i1 to i32
    %c0_i32_14 = arith.constant 0 : i32
    %38 = arith.cmpi ne, %37, %c0_i32_14 : i32
    scf.if %38 {
      %50 = arith.index_cast %arg2 : i32 to index
      %c0_22 = arith.constant 0 : index
      %c0_23 = arith.constant 0 : index
      %c0_24 = arith.constant 0 : index
      %51 = vector.load %arg7[%50, %c0_22, %c0_23, %c0_24] : memref<1x2x128x128xf32, #tpu.memory_space<vmem>>, vector<1x2x128x128xf32>
      %52 = vector.shape_cast %51 : vector<1x2x128x128xf32> to vector<2x128x128xf32>
      %53 = arith.minimumf %52, %26 : vector<2x128x128xf32>
      %54 = arith.index_cast %arg2 : i32 to index
      %c0_25 = arith.constant 0 : index
      %c0_26 = arith.constant 0 : index
      %c0_27 = arith.constant 0 : index
      %55 = vector.load %arg7[%54, %c0_25, %c0_26, %c0_27] : memref<1x2x128x128xf32, #tpu.memory_space<vmem>>, vector<1x2x128x128xf32>
      %56 = vector.shape_cast %55 : vector<1x2x128x128xf32> to vector<2x128x128xf32>
      %57 = vector.shape_cast %53 : vector<2x128x128xf32> to vector<1x2x128x128xf32>
      tpu.vector_store %arg7[%54, %c0_25, %c0_26, %c0_27], %57 {strides = array<i32>} : memref<1x2x128x128xf32, #tpu.memory_space<vmem>>, vector<1x2x128x128xf32>,
    } else {
    }
    %c0_i32_15 = arith.constant 0 : i32
    %39 = arith.cmpi eq, %arg2, %c0_i32_15 : i32
    %40 = arith.extui %39 : i1 to i32
    %c0_i32_16 = arith.constant 0 : i32
    %41 = arith.cmpi ne, %40, %c0_i32_16 : i32
    scf.if %41 {
      %c0_22 = arith.constant 0 : index
      %c0_23 = arith.constant 0 : index
      %c0_24 = arith.constant 0 : index
      %50 = vector.load %arg6[%c0_22, %c0_23, %c0_24] : memref<2x128x128xf32, #tpu.memory_space<vmem>>, vector<2x128x128xf32>
      %cst = arith.constant dense<0x7F800000> : vector<2x128xf32>
      %51 = vector.multi_reduction <minimumf>, %50, %cst [2] : vector<2x128x128xf32> to vector<2x128xf32>
      %52 = vector.shape_cast %51 : vector<2x128xf32> to vector<2x128x1xf32>
      %c0_25 = arith.constant 0 : index
      %c0_26 = arith.constant 0 : index
      %c0_27 = arith.constant 0 : index
      %53 = vector.load %arg8[%c0_25, %c0_26, %c0_27] : memref<2x1x128xf32, #tpu.memory_space<vmem>>, vector<2x1x128xf32>
      %cst_28 = arith.constant dense<0.000000e+00> : vector<2x1xf32>
      %54 = vector.multi_reduction <add>, %52, %cst_28 [1] : vector<2x128x1xf32> to vector<2x1xf32>
      %55 = vector.shape_cast %54 : vector<2x1xf32> to vector<2x1x1xf32>
      %56 = vector.broadcast %55 : vector<2x1x1xf32> to vector<2x1x128xf32>
      %57 = arith.addf %53, %56 : vector<2x1x128xf32>
      %c0_29 = arith.constant 0 : index
      %c0_30 = arith.constant 0 : index
      %c0_31 = arith.constant 0 : index
      %58 = vector.load %arg8[%c0_29, %c0_30, %c0_31] : memref<2x1x128xf32, #tpu.memory_space<vmem>>, vector<2x1x128xf32>
      tpu.vector_store %arg8[%c0_29, %c0_30, %c0_31], %57 {strides = array<i32>} : memref<2x1x128xf32, #tpu.memory_space<vmem>>, vector<2x1x128xf32>,
    } else {
    }
    %c0_i32_17 = arith.constant 0 : i32
    %42 = arith.cmpi eq, %arg1, %c0_i32_17 : i32
    %43 = arith.extui %42 : i1 to i32
    %c0_i32_18 = arith.constant 0 : i32
    %44 = arith.cmpi ne, %43, %c0_i32_18 : i32
    scf.if %44 {
      %50 = arith.index_cast %arg2 : i32 to index
      %c0_22 = arith.constant 0 : index
      %c0_23 = arith.constant 0 : index
      %c0_24 = arith.constant 0 : index
      %51 = vector.load %arg7[%50, %c0_22, %c0_23, %c0_24] : memref<1x2x128x128xf32, #tpu.memory_space<vmem>>, vector<1x2x128x128xf32>
      %52 = vector.shape_cast %51 : vector<1x2x128x128xf32> to vector<2x128x128xf32>
      %cst = arith.constant dense<0x7F800000> : vector<2x128xf32>
      %53 = vector.multi_reduction <minimumf>, %52, %cst [1] : vector<2x128x128xf32> to vector<2x128xf32>
      %54 = vector.shape_cast %53 : vector<2x128xf32> to vector<2x1x128xf32>
      %c0_25 = arith.constant 0 : index
      %c0_26 = arith.constant 0 : index
      %c0_27 = arith.constant 0 : index
      %55 = vector.load %arg9[%c0_25, %c0_26, %c0_27] : memref<2x1x128xf32, #tpu.memory_space<vmem>>, vector<2x1x128xf32>
      %cst_28 = arith.constant dense<0.000000e+00> : vector<2x1xf32>
      %56 = vector.multi_reduction <add>, %54, %cst_28 [2] : vector<2x1x128xf32> to vector<2x1xf32>
      %57 = vector.shape_cast %56 : vector<2x1xf32> to vector<2x1x1xf32>
      %58 = vector.broadcast %57 : vector<2x1x1xf32> to vector<2x1x128xf32>
      %59 = arith.addf %55, %58 : vector<2x1x128xf32>
      %c0_29 = arith.constant 0 : index
      %c0_30 = arith.constant 0 : index
      %c0_31 = arith.constant 0 : index
      %60 = vector.load %arg9[%c0_29, %c0_30, %c0_31] : memref<2x1x128xf32, #tpu.memory_space<vmem>>, vector<2x1x128xf32>
      tpu.vector_store %arg9[%c0_29, %c0_30, %c0_31], %59 {strides = array<i32>} : memref<2x1x128xf32, #tpu.memory_space<vmem>>, vector<2x1x128xf32>,
    } else {
    }
    %c0_i32_19 = arith.constant 0 : i32
    %45 = arith.cmpi eq, %arg1, %c0_i32_19 : i32
    %c0_i32_20 = arith.constant 0 : i32
    %46 = arith.cmpi eq, %arg2, %c0_i32_20 : i32
    %47 = arith.andi %45, %46 : i1
    %48 = arith.extui %47 : i1 to i32
    %c0_i32_21 = arith.constant 0 : i32
    %49 = arith.cmpi ne, %48, %c0_i32_21 : i32
    scf.if %49 {
      %c0_22 = arith.constant 0 : index
      %c0_23 = arith.constant 0 : index
      %c0_24 = arith.constant 0 : index
      %50 = vector.load %arg8[%c0_22, %c0_23, %c0_24] : memref<2x1x128xf32, #tpu.memory_space<vmem>>, vector<2x1x128xf32>
      %cst = arith.constant 7.812500e-03 : f32
      %51 = vector.broadcast %cst : f32 to vector<2x1x128xf32>
      %52 = arith.mulf %50, %51 : vector<2x1x128xf32>
      %c0_25 = arith.constant 0 : index
      %c0_26 = arith.constant 0 : index
      %c0_27 = arith.constant 0 : index
      %53 = vector.load %arg9[%c0_25, %c0_26, %c0_27] : memref<2x1x128xf32, #tpu.memory_space<vmem>>, vector<2x1x128xf32>
      %cst_28 = arith.constant 7.812500e-03 : f32
      %54 = vector.broadcast %cst_28 : f32 to vector<2x1x128xf32>
      %55 = arith.mulf %53, %54 : vector<2x1x128xf32>
      %56 = tpu.iota {dimensions = array<i32: 2>} : vector<2x1x128xi32>
      %c0_i32_29 = arith.constant 0 : i32
      %57 = vector.broadcast %c0_i32_29 : i32 to vector<2x1x128xi32>
      %58 = arith.cmpi eq, %56, %57 : vector<2x1x128xi32>
      %c1_i32 = arith.constant 1 : i32
      %59 = vector.broadcast %c1_i32 : i32 to vector<2x1x128xi32>
      %60 = arith.cmpi eq, %56, %59 : vector<2x1x128xi32>
      %cst_30 = arith.constant 0.000000e+00 : f32
      %61 = vector.broadcast %cst_30 : f32 to vector<2x1x128xf32>
      %62 = arith.select %60, %55, %61 : vector<2x1x128xi1>, vector<2x1x128xf32>
      %63 = arith.select %58, %52, %62 : vector<2x1x128xi1>, vector<2x1x128xf32>
      %c0_31 = arith.constant 0 : index
      %c0_32 = arith.constant 0 : index
      %c0_33 = arith.constant 0 : index
      %64 = vector.load %arg5[%c0_31, %c0_32, %c0_33] : memref<2x1x128xf32, #tpu.memory_space<vmem>>, vector<2x1x128xf32>
      tpu.vector_store %arg5[%c0_31, %c0_32, %c0_33], %63 {strides = array<i32>} : memref<2x1x128xf32, #tpu.memory_space<vmem>>, vector<2x1x128xf32>,
    } else {
    }
    return
  }
  func.func @transform_0(%arg0: i32, %arg1: i32, %arg2: i32) -> (i32, i32, i32) {
    %c0_i32 = arith.constant 0 : i32
    %c0_i32_0 = arith.constant 0 : i32
    return %arg0, %arg1, %c0_i32 : i32, i32, i32
  }
  func.func @transform_1(%arg0: i32, %arg1: i32, %arg2: i32) -> (i32, i32, i32) {
    %c0_i32 = arith.constant 0 : i32
    %c0_i32_0 = arith.constant 0 : i32
    return %arg0, %c0_i32, %arg2 : i32, i32, i32
  }
  func.func @transform_2(%arg0: i32, %arg1: i32, %arg2: i32) -> (i32, i32, i32) {
    %c0_i32 = arith.constant 0 : i32
    %c0_i32_0 = arith.constant 0 : i32
    %c0_i32_1 = arith.constant 0 : i32
    return %arg0, %c0_i32, %c0_i32_0 : i32, i32, i32
  }
}

</mosaic_0001>

<bundles_post_ra>
// kernel: tpu_custom_call.1
= control target key start
LH: loop header
LB: loop body
LE: loop exit
PB: predicated region body
PF: predicated region fallthrough
CT: control target
= control target key end

     0   :  { %v1335_v2 = vmov 0   ;;  %s2007_s0 = inlined_call_operand.vmem [shape: f32[2,128,3], index: 0, kind: input, shape index: {}]   ;;  %s2008_s1 = inlined_call_operand.vmem [shape: f32[2,3,128], index: 1, kind: input, shape index: {}]   ;;  %s2009_s2 = inlined_call_operand.hbm [shape: f32[2,1,128], index: 2, kind: output, shape index: {}]  }
   0x1   :  { %v1360_v0 = vld [vmem:[%s2007_s0 + $0x10] sm:$0xff]  ;;  %v1365_v1 = vld [vmem:[%s2007_s0] sm:$0xff]  ;;  %1306 = vset.pattern.permute.xlu1 %v1335_v2  ;;  %1305 = vset.pattern.permute.xlu0 %v1335_v2  ;;  %v1372_v3 = vld [vmem:[%s2007_s0 + $0x18] sm:$0xff] }
   0x2   :  { %68 = vperm.xlu1 %1306, %v1360_v0   ;;  %58 = vperm.xlu0 %1305, %v1365_v1   ;;  %v1377_v4 = vld [vmem:[%s2007_s0 + $0x8] sm:$0xff]  ;;  %v1389_v6 = vld [vmem:[%s2007_s0 + $0x20] sm:$0xff]  ;;  %v1396_v7 = vld [vmem:[%s2007_s0 + $0x38] sm:$0xff] }
   0x3   :  { %v1384_v5 = vld [vmem:[%s2007_s0 + $0x28] sm:$0xff]  ;;  %v1401_v8 = vld [vmem:[%s2007_s0 + $0x30] sm:$0xff] }
   0x6   :  { %73 = vperm.xlu1 %1306, %v1372_v3   ;;  %63 = vperm.xlu0 %1305, %v1377_v4  }
   0xa   :  { %83 = vperm.xlu1 %1306, %v1384_v5   ;;  %78 = vperm.xlu0 %1305, %v1389_v6  }
   0xb   :  { %7 = vsyncpa [#allocation7], 0  ;;  %v1408_v9 = vld [vmem:[%s2007_s0 + $0x48] sm:$0xff]  ;;  %v1413_v10 = vld [vmem:[%s2007_s0 + $0x40] sm:$0xff]  ;;  %v1336_v33 = vmov 1   ;;  %v1337_v36 = vmov 2  }
   0xc   :  { %v1420_v11 = vld [vmem:[%s2007_s0 + $0x58] sm:$0xff]  ;;  %v1425_v12 = vld [vmem:[%s2007_s0 + $0x50] sm:$0xff]  ;;  %v1432_v13 = vld [vmem:[%s2007_s0 + $0x68] sm:$0xff] }
   0xd   :  { %v1437_v14 = vld [vmem:[%s2007_s0 + $0x60] sm:$0xff]  ;;  %v1444_v15 = vld [vmem:[%s2007_s0 + $0x78] sm:$0xff]  ;;  %v1449_v16 = vld [vmem:[%s2007_s0 + $0x70] sm:$0xff] }
   0xe   :  { %93 = vperm.xlu1 %1306, %v1396_v7   ;;  %88 = vperm.xlu0 %1305, %v1401_v8   ;;  %v1456_v17 = vld [vmem:[%s2007_s0 + $0x88] sm:$0xff]  ;;  %v1461_v18 = vld [vmem:[%s2007_s0 + $0x80] sm:$0xff]  ;;  %v1468_v19 = vld [vmem:[%s2007_s0 + $0x98] sm:$0xff] }
   0xf   :  { %v1473_v20 = vld [vmem:[%s2007_s0 + $0x90] sm:$0xff]  ;;  %v1480_v21 = vld [vmem:[%s2007_s0 + $0xa8] sm:$0xff]  ;;  %v1485_v22 = vld [vmem:[%s2007_s0 + $0xa0] sm:$0xff] }
  0x10   :  { %v1492_v23 = vld [vmem:[%s2007_s0 + $0xb8] sm:$0xff]  ;;  %v1497_v24 = vld [vmem:[%s2007_s0 + $0xb0] sm:$0xff]  ;;  %v1504_v25 = vld [vmem:[%s2007_s0 + $0xc8] sm:$0xff] }
  0x11   :  { %v1509_v26 = vld [vmem:[%s2007_s0 + $0xc0] sm:$0xff]  ;;  %v1516_v27 = vld [vmem:[%s2007_s0 + $0xd8] sm:$0xff]  ;;  %v1521_v28 = vld [vmem:[%s2007_s0 + $0xd0] sm:$0xff] }
  0x12   :  { %103 = vperm.xlu1 %1306, %v1408_v9   ;;  %98 = vperm.xlu0 %1305, %v1413_v10   ;;  %v1528_v29 = vld [vmem:[%s2007_s0 + $0xe8] sm:$0xff]  ;;  %v1533_v30 = vld [vmem:[%s2007_s0 + $0xe0] sm:$0xff]  ;;  %v1540_v31 = vld [vmem:[%s2007_s0 + $0xf8] sm:$0xff] }
  0x13   :  { %v1545_v32 = vld [vmem:[%s2007_s0 + $0xf0] sm:$0xff] }
  0x16   :  { %113 = vperm.xlu1 %1306, %v1420_v11   ;;  %108 = vperm.xlu0 %1305, %v1425_v12  }
  0x1a   :  { %123 = vperm.xlu1 %1306, %v1432_v13   ;;  %118 = vperm.xlu0 %1305, %v1437_v14  }
  0x1e   :  { %133 = vperm.xlu1 %1306, %v1444_v15   ;;  %128 = vperm.xlu0 %1305, %v1449_v16  }
  0x22   :  { %143 = vperm.xlu1 %1306, %v1456_v17   ;;  %138 = vperm.xlu0 %1305, %v1461_v18  }
  0x26   :  { %153 = vperm.xlu1 %1306, %v1468_v19   ;;  %148 = vperm.xlu0 %1305, %v1473_v20  }
  0x2a   :  { %163 = vperm.xlu1 %1306, %v1480_v21   ;;  %158 = vperm.xlu0 %1305, %v1485_v22  }
  0x2e   :  { %173 = vperm.xlu1 %1306, %v1492_v23   ;;  %168 = vperm.xlu0 %1305, %v1497_v24  }
  0x32   :  { %183 = vperm.xlu1 %1306, %v1504_v25   ;;  %178 = vperm.xlu0 %1305, %v1509_v26  }
  0x36   :  { %193 = vperm.xlu1 %1306, %v1516_v27   ;;  %188 = vperm.xlu0 %1305, %v1521_v28  }
  0x3a   :  { %203 = vperm.xlu1 %1306, %v1528_v29   ;;  %198 = vperm.xlu0 %1305, %v1533_v30  }
  0x3e   :  { %213 = vperm.xlu1 %1306, %v1540_v31   ;;  %208 = vperm.xlu0 %1305, %v1545_v32  }
  0x42   :  { %1308 = vset.pattern.permute.xlu1 %v1336_v33  ;;  %1307 = vset.pattern.permute.xlu0 %v1336_v33 }
  0x43   :  { %293 = vperm.xlu1 %1308, %v1377_v4   ;;  %289 = vperm.xlu0 %1307, %v1365_v1  }
  0x47   :  { %297 = vperm.xlu1 %1308, %v1360_v0   ;;  %301 = vperm.xlu0 %1307, %v1372_v3  }
  0x4b   :  { %305 = vperm.xlu1 %1308, %v1389_v6   ;;  %309 = vperm.xlu0 %1307, %v1384_v5  }
  0x4f   :  { %313 = vperm.xlu1 %1308, %v1401_v8   ;;  %317 = vperm.xlu0 %1307, %v1396_v7  }
  0x53   :  { %321 = vperm.xlu1 %1308, %v1413_v10   ;;  %325 = vperm.xlu0 %1307, %v1408_v9  }
  0x57   :  { %329 = vperm.xlu1 %1308, %v1425_v12   ;;  %333 = vperm.xlu0 %1307, %v1420_v11  }
  0x5b   :  { %337 = vperm.xlu1 %1308, %v1437_v14   ;;  %341 = vperm.xlu0 %1307, %v1432_v13  }
  0x5f   :  { %345 = vperm.xlu1 %1308, %v1449_v16   ;;  %349 = vperm.xlu0 %1307, %v1444_v15  }
  0x63   :  { %353 = vperm.xlu1 %1308, %v1461_v18   ;;  %357 = vperm.xlu0 %1307, %v1456_v17  }
  0x67   :  { %361 = vperm.xlu1 %1308, %v1473_v20   ;;  %365 = vperm.xlu0 %1307, %v1468_v19  }
  0x6b   :  { %369 = vperm.xlu1 %1308, %v1485_v22   ;;  %373 = vperm.xlu0 %1307, %v1480_v21  }
  0x6f   :  { %377 = vperm.xlu1 %1308, %v1497_v24   ;;  %381 = vperm.xlu0 %1307, %v1492_v23  }
  0x73   :  { %385 = vperm.xlu1 %1308, %v1509_v26   ;;  %389 = vperm.xlu0 %1307, %v1504_v25  }
  0x77   :  { %393 = vperm.xlu1 %1308, %v1521_v28   ;;  %397 = vperm.xlu0 %1307, %v1516_v27  }
  0x7b   :  { %401 = vperm.xlu1 %1308, %v1533_v30   ;;  %405 = vperm.xlu0 %1307, %v1528_v29  }
  0x7f   :  { %409 = vperm.xlu1 %1308, %v1545_v32   ;;  %413 = vperm.xlu0 %1307, %v1540_v31  }
  0x81   :  { %v1581_v34 = vpop.permute.xlu1 %68  ;;  %v1583_v35 = vpop.permute.xlu0 %58 }
  0x83   :  { %1309 = vset.pattern.permute.xlu1 %v1337_v36  ;;  %1310 = vset.pattern.permute.xlu0 %v1337_v36 }
  0x84   :  { %521 = vperm.xlu1 %1309, %v1365_v1   ;;  %525 = vperm.xlu0 %1310, %v1377_v4  }
  0x85   :  { %v1587_v37 = vpop.permute.xlu1 %73  ;;  %v1589_v38 = vpop.permute.xlu0 %63 }
  0x88   :  { %529 = vperm.xlu1 %1309, %v1360_v0   ;;  %589 = vperm.xlu0 %1310, %v1456_v17  }
  0x89   :  { %v1593_v39 = vpop.permute.xlu1 %83  ;;  %v1595_v40 = vpop.permute.xlu0 %78 }
  0x8c   :  { %585 = vperm.xlu1 %1309, %v1461_v18   ;;  %533 = vperm.xlu0 %1310, %v1372_v3  }
  0x8d   :  { %v1599_v41 = vpop.permute.xlu1 %93  ;;  %v1601_v42 = vpop.permute.xlu0 %88 }
  0x90   :  { %593 = vperm.xlu1 %1309, %v1473_v20   ;;  %537 = vperm.xlu0 %1310, %v1389_v6  }
  0x91   :  { %v1605_v43 = vpop.permute.xlu1 %103  ;;  %v1607_v44 = vpop.permute.xlu0 %98 }
  0x94   :  { %597 = vperm.xlu1 %1309, %v1468_v19   ;;  %541 = vperm.xlu0 %1310, %v1384_v5  }
  0x95   :  { %v1611_v45 = vpop.permute.xlu1 %113  ;;  %v1613_v46 = vpop.permute.xlu0 %108 }
  0x98   :  { %601 = vperm.xlu1 %1309, %v1485_v22   ;;  %545 = vperm.xlu0 %1310, %v1401_v8  }
  0x99   :  { %v1617_v47 = vpop.permute.xlu1 %123  ;;  %v1619_v48 = vpop.permute.xlu0 %118 }
  0x9c   :  { %605 = vperm.xlu1 %1309, %v1480_v21   ;;  %549 = vperm.xlu0 %1310, %v1396_v7  }
  0x9d   :  { %v1623_v49 = vpop.permute.xlu1 %133  ;;  %v1625_v50 = vpop.permute.xlu0 %128 }
  0x9e   :  { %2011 = vst [vmem:[#allocation9_spill] sm:$0xff] %v1623_v49  ;;  %2012 = vst [vmem:[#allocation10_spill] sm:$0xff] %v1625_v50 }
  0xa0   :  { %609 = vperm.xlu1 %1309, %v1497_v24   ;;  %553 = vperm.xlu0 %1310, %v1413_v10  }
  0xa1   :  { %v1629_v51 = vpop.permute.xlu1 %143  ;;  %v1631_v52 = vpop.permute.xlu0 %138 }
  0xa4   :  { %613 = vperm.xlu1 %1309, %v1492_v23   ;;  %557 = vperm.xlu0 %1310, %v1408_v9  }
  0xa5   :  { %v1635_v53 = vpop.permute.xlu1 %153  ;;  %v1637_v54 = vpop.permute.xlu0 %148 }
  0xa8   :  { %617 = vperm.xlu1 %1309, %v1509_v26   ;;  %561 = vperm.xlu0 %1310, %v1425_v12  }
  0xa9   :  { %v1641_v55 = vpop.permute.xlu1 %163  ;;  %v1643_v56 = vpop.permute.xlu0 %158 }
  0xac   :  { %621 = vperm.xlu1 %1309, %v1504_v25   ;;  %565 = vperm.xlu0 %1310, %v1420_v11   ;;  %v2010_v25 = vlaneseq }
  0xad   :  { %v1647_v57 = vpop.permute.xlu1 %173  ;;  %v1649_v58 = vpop.permute.xlu0 %168 }
  0xb0   :  { %625 = vperm.xlu1 %1309, %v1521_v28   ;;  %569 = vperm.xlu0 %1310, %v1437_v14   ;;  %v217_v28 = vshrl.u32 %v2010_v25, 7 }
  0xb1   :  { %v1653_v59 = vpop.permute.xlu1 %183  ;;  %v1655_v60 = vpop.permute.xlu0 %178 }
  0xb2   :  { %2013 = vst [vmem:[#allocation11_spill] sm:$0xff] %v1653_v59  ;;  %2014 = vst [vmem:[#allocation12_spill] sm:$0xff] %v1655_v60 }
  0xb4   :  { %629 = vperm.xlu1 %1309, %v1516_v27   ;;  %573 = vperm.xlu0 %1310, %v1432_v13  }
  0xb5   :  { %v1659_v61 = vpop.permute.xlu1 %193  ;;  %v1661_v62 = vpop.permute.xlu0 %188 }
  0xb6   :  { %2015 = vst [vmem:[#allocation13_spill] sm:$0xff] %v1659_v61  ;;  %2016 = vst [vmem:[#allocation14_spill] sm:$0xff] %v1661_v62 }
  0xb8   :  { %633 = vperm.xlu1 %1309, %v1533_v30   ;;  %577 = vperm.xlu0 %1310, %v1449_v16  }
  0xb9   :  { %v1665_v63 = vpop.permute.xlu1 %203  ;;  %v1667_v0 = vpop.permute.xlu0 %198 }
  0xba   :  { %2017 = vst [vmem:[#allocation15_spill] sm:$0xff] %v1665_v63  ;;  %2018 = vst [vmem:[#allocation16_spill] sm:$0xff] %v1667_v0  ;;  %v650_v0 = vsub.s32 2, %v217_v28 }
  0xbc   :  { %637 = vperm.xlu1 %1309, %v1528_v29   ;;  %641 = vperm.xlu0 %1310, %v1545_v32   ;;  %v218_v32 = vsub.s32 0, %v217_v28 }
  0xbd   :  { %v1671_v1 = vpop.permute.xlu1 %213  ;;  %v1673_v2 = vpop.permute.xlu0 %208 }
  0xbe   :  { %2019 = vst [vmem:[#allocation17_spill] sm:$0xff] %v1671_v1  ;;  %2020 = vst [vmem:[#allocation18_spill] sm:$0xff] %v1673_v2  ;;  %v54_v1 = vld [vmem:[%s2008_s1] sm:$0x7] }
  0xbf   :  { %v1731_v63 = vrot.slane %v54_v1, %v218_v32 }
  0xc0   :  { %581 = vperm.xlu1 %1309, %v1444_v15  }
  0xc1   :  { %v226_v61 = vsub.f32 %v1581_v34, %v1731_v63  ;;  %v224_v50 = vsub.f32 %v1583_v35, %v1731_v63  ;;  %v229_v34 = vsub.f32 %v1593_v39, %v1731_v63  ;;  %v1756_v35 = vrot.slane %v54_v1, %v650_v0 }
  0xc2   :  { %v294_v3 = vpop.permute.xlu1 %293  ;;  %v290_v4 = vpop.permute.xlu0 %289  ;;  %v231_v39 = vsub.f32 %v1599_v41, %v1731_v63 }
  0xc4   :  { %645 = vperm.xlu1 %1309, %v1540_v31   ;;  %v418_v31 = vsub.s32 1, %v217_v28  ;;  %v225_v28 = vsub.f32 %v1589_v38, %v1731_v63 }
  0xc6   :  { %v298_v5 = vpop.permute.xlu1 %297  ;;  %v1677_v6 = vpop.permute.xlu0 %301  ;;  %v1729_v2 = vrot.slane %v54_v1, %v418_v31  ;;  %v257_v38 = vmul.f32 %v225_v28, %v225_v28  ;;  %v230_v1 = vsub.f32 %v1601_v42, %v1731_v63 }
  0xc8   :  { %v425_v49 = vsub.f32 %v294_v3, %v1729_v2  ;;  %v227_v3 = vsub.f32 %v1587_v37, %v1731_v63  ;;  %v228_v37 = vsub.f32 %v1595_v40, %v1731_v63  ;;  %v427_v41 = vsub.f32 %v1677_v6, %v1729_v2 }
  0xc9   :  { %v1782_v60 = vmul.f32 %v230_v1, %v230_v1 }
  0xca   :  { %v1679_v7 = vpop.permute.xlu1 %305  ;;  %v1681_v8 = vpop.permute.xlu0 %309 }
  0xce   :  { %v1683_v9 = vpop.permute.xlu1 %313  ;;  %v1685_v10 = vpop.permute.xlu0 %317 }
  0xd2   :  { %v1687_v11 = vpop.permute.xlu1 %321  ;;  %v1689_v12 = vpop.permute.xlu0 %325 }
  0xd6   :  { %v1691_v13 = vpop.permute.xlu1 %329  ;;  %v1693_v14 = vpop.permute.xlu0 %333 }
  0xda   :  { %v1695_v15 = vpop.permute.xlu1 %337  ;;  %v1697_v16 = vpop.permute.xlu0 %341 }
  0xdb   :  { %2021 = vst [vmem:[#allocation19_spill] sm:$0xff] %v1695_v15  ;;  %2022 = vst [vmem:[#allocation20_spill] sm:$0xff] %v1697_v16 }
  0xde   :  { %v1699_v17 = vpop.permute.xlu1 %345  ;;  %v1701_v18 = vpop.permute.xlu0 %349 }
  0xdf   :  { %2023 = vst [vmem:[#allocation21_spill] sm:$0xff] %v1699_v17  ;;  %2024 = vst [vmem:[#allocation22_spill] sm:$0xff] %v1701_v18  ;;  %v424_v17 = vsub.f32 %v290_v4, %v1729_v2  ;;  %v426_v4 = vsub.f32 %v298_v5, %v1729_v2  ;;  %v259_v5 = vmul.f32 %v227_v3, %v227_v3 }
  0xe0   :  { %v260_v3 = vmul.f32 %v228_v37, %v228_v37  ;;  %v428_v37 = vsub.f32 %v1679_v7, %v1729_v2 }
  0xe1   :  { %v456_v59 = vmul.f32 %v424_v17, %v424_v17  ;;  %v458_v40 = vmul.f32 %v426_v4, %v426_v4 }
  0xe2   :  { %v354_v19 = vpop.permute.xlu1 %353  ;;  %v1703_v20 = vpop.permute.xlu0 %357 }
  0xe6   :  { %v1705_v21 = vpop.permute.xlu1 %361  ;;  %v1707_v22 = vpop.permute.xlu0 %365 }
  0xea   :  { %v1709_v23 = vpop.permute.xlu1 %369  ;;  %v1711_v24 = vpop.permute.xlu0 %373 }
  0xee   :  { %v1713_v26 = vpop.permute.xlu1 %377  ;;  %v1715_v27 = vpop.permute.xlu0 %381 }
  0xf2   :  { %v1718_v29 = vpop.permute.xlu1 %385  ;;  %v1720_v30 = vpop.permute.xlu0 %389 }
  0xf3   :  { %2025 = vst [vmem:[#allocation23_spill] sm:$0xff] %v1720_v30 }
  0xf6   :  { %v1722_v33 = vpop.permute.xlu1 %393  ;;  %v1724_v36 = vpop.permute.xlu0 %397 }
  0xf7   :  { %2026 = vst [vmem:[#allocation24_spill] sm:$0xff] %v1722_v33  ;;  %2027 = vst [vmem:[#allocation25_spill] sm:$0xff] %v1724_v36  ;;  %v55_v36 = vld [vmem:[%s2008_s1 + $0x4] sm:$0x7]  ;;  %v457_v33 = vmul.f32 %v425_v49, %v425_v49  ;;  %s1339_s1 = smov [#allocation6]  }
  0xf8   :  { %v1761_v16 = vrot.slane %v55_v36, %v418_v31  ;;  %v1763_v30 = vrot.slane %v55_v36, %v650_v0  ;;  %v1771_v31 = vmul.f32 %v229_v34, %v229_v34  ;;  %v233_v0 = vsub.f32 %v1605_v43, %v1731_v63  ;;  %s1287_s20 = sshll.u32 %s1339_s1, 4  ;;  %s1288_s20 = int_to_ptr.vmem [resolvable:$true] %s1287_s20 }
  0xf9   :  { %v489_v17 = vadd.f32 %v457_v33, %v257_v38  ;;  %v1780_v34 = vmul.f32 %v231_v39, %v231_v39  ;;  %v459_v38 = vmul.f32 %v427_v41, %v427_v41  ;;  %s1311_s21 = scalar_lea.vmem %s1288_s20, 32  ;;  %p1316_p1 = scmp.lt.s32.totalorder %s1288_s20, %s1288_s20 }
  0xfa   :  { %v1733_v18 = vpop.permute.xlu1 %401  ;;  %v1735_v25 = vpop.permute.xlu0 %405  ;;  %v440_v42 = vsub.f32 %v354_v19, %v1761_v16  ;;  %p1312_p0 = scmp.ne.s32.totalorder %s1288_s20, %s1311_s21  ;;  %p1317_p2 = scmp.lt.s32.totalorder %s1311_s21, %s1311_s21 }
  0xfb   :  { %2028 = vst [vmem:[#allocation26_spill] sm:$0xff] %v1733_v18  ;;  %2029 = vst [vmem:[#allocation27_spill] sm:$0xff] %v1735_v25  ;;  %v1758_v25 = vrot.slane %v55_v36, %v218_v32  ;;  %v491_v41 = vadd.f32 %v459_v38, %v259_v5 }
  0xfc   :  { %v472_v39 = vmul.f32 %v440_v42, %v440_v42  ;;  %v429_v42 = vsub.f32 %v1681_v8, %v1729_v2  ;;  %p1318_p3 = por %p1317_p2, %p1316_p1 }
  0xfd   :  { %v240_v33 = vsub.f32 %v1631_v52, %v1758_v25  ;;  %v242_v5 = vsub.f32 %v1637_v54, %v1758_v25  ;;  %v443_v54 = vsub.f32 %v1707_v22, %v1761_v16 }
  0xfe   :  { %v1746_v62 = vpop.permute.xlu1 %409  ;;  %v1748_v18 = vpop.permute.xlu0 %413  ;;  %p1319_p4 = pnand %p1318_p3, %p1312_p0 }
  0xff   :  { %2030 = vst [vmem:[#allocation28_spill] sm:$0xff] %v1746_v62  ;;  %2031 = vst [vmem:[#allocation29_spill] sm:$0xff] %v1748_v18  ;;  %v258_v62 = vmul.f32 %v226_v61, %v226_v61  ;;  %v256_v18 = vmul.f32 %v224_v50, %v224_v50 }
 0x101   :  { %v488_v36 = vadd.f32 %v456_v59, %v256_v18  ;;  %v1793_v18 = vmul.f32 %v233_v0, %v233_v0  ;;  %v490_v19 = vadd.f32 %v458_v40, %v258_v62  ;;  %v241_v62 = vsub.f32 %v1629_v51, %v1758_v25 }
 0x102   :  { %v272_v0 = vmul.f32 %v240_v33, %v240_v33  ;;  %v243_v33 = vsub.f32 %v1635_v53, %v1758_v25 }
 0x103   :  { %v522_v49 = vpop.permute.xlu1 %521  ;;  %v526_v32 = vpop.permute.xlu0 %525 }
 0x104   :  { %v656_v50 = vsub.f32 %v522_v49, %v1756_v35  ;;  %v657_v61 = vsub.f32 %v526_v32, %v1756_v35  ;;  %v232_v49 = vsub.f32 %v1607_v44, %v1731_v63  ;;  %v441_v44 = vsub.f32 %v1703_v20, %v1761_v16 }
 0x105   :  { %v504_v51 = vadd.f32 %v472_v39, %v272_v0  ;;  %v274_v0 = vmul.f32 %v242_v5, %v242_v5  ;;  %v244_v5 = vsub.f32 %v1643_v56, %v1758_v25 }
 0x106   :  { %v688_v28 = vmul.f32 %v656_v50, %v656_v50  ;;  %v689_v15 = vmul.f32 %v657_v61, %v657_v61  ;;  %v1801_v52 = vmul.f32 %v232_v49, %v232_v49 }
 0x107   :  { %v530_v32 = vpop.permute.xlu1 %529  ;;  %v590_v43 = vpop.permute.xlu0 %589 }
 0x108   :  { %v1788_v4 = vadd.f32 %v689_v15, %v489_v17  ;;  %v658_v59 = vsub.f32 %v530_v32, %v1756_v35  ;;  %v1791_v6 = vadd.f32 %v688_v28, %v488_v36  ;;  %v235_v15 = vsub.f32 %v1611_v45, %v1731_v63 }
 0x109   :  { %v673_v50 = vsub.f32 %v590_v43, %v1763_v30  ;;  %v460_v36 = vmul.f32 %v428_v37, %v428_v37  ;;  %v442_v45 = vsub.f32 %v1705_v21, %v1761_v16  ;;  %v473_v28 = vmul.f32 %v441_v44, %v441_v44 }
 0x10a   :  { %v690_v1 = vmul.f32 %v658_v59, %v658_v59  ;;  %1061 = vmin.xlane.f32.xlu0 %v1791_v6  ;;  %1063 = vmin.xlane.f32.xlu1 %v1788_v4  ;;  %v273_v43 = vmul.f32 %v241_v62, %v241_v62  ;;  %v430_v62 = vsub.f32 %v1683_v9, %v1729_v2 }
 0x10b   :  { %v586_v7 = vpop.permute.xlu1 %585  ;;  %v534_v61 = vpop.permute.xlu0 %533  ;;  %v705_v59 = vmul.f32 %v673_v50, %v673_v50  ;;  %v492_v44 = vadd.f32 %v460_v36, %v260_v3  ;;  %v431_v3 = vsub.f32 %v1685_v10, %v1729_v2 }
 0x10c   :  { %v1808_v17 = vadd.f32 %v690_v1, %v490_v19  ;;  %v672_v20 = vsub.f32 %v586_v7, %v1763_v30  ;;  %v659_v40 = vsub.f32 %v534_v61, %v1756_v35  ;;  %v461_v1 = vmul.f32 %v429_v42, %v429_v42 }
 0x10d   :  { %v474_v7 = vmul.f32 %v442_v45, %v442_v45  ;;  %v505_v53 = vadd.f32 %v473_v28, %v273_v43  ;;  %v234_v61 = vsub.f32 %v1613_v46, %v1731_v63  ;;  %v1838_v45 = vmul.f32 %v235_v15, %v235_v15 }
 0x10e   :  { %v704_v49 = vmul.f32 %v672_v20, %v672_v20  ;;  %v691_v32 = vmul.f32 %v659_v40, %v659_v40  ;;  %1065 = vmin.xlane.f32.xlu1 %v1808_v17  ;;  %v444_v46 = vsub.f32 %v1709_v23, %v1761_v16  ;;  %v493_v10 = vadd.f32 %v461_v1, %v1771_v31 }
 0x10f   :  { %v594_v19 = vpop.permute.xlu1 %593  ;;  %v538_v38 = vpop.permute.xlu0 %537  ;;  %v1834_v9 = vadd.f32 %v705_v59, %v505_v53  ;;  %v506_v28 = vadd.f32 %v474_v7, %v274_v0  ;;  %v463_v59 = vmul.f32 %v431_v3, %v431_v3  ;;  %v432_v1 = vsub.f32 %v1687_v11, %v1729_v2 }
 0x110   :  { %v723_v8 = vadd.f32 %v691_v32, %v491_v41  ;;  %v674_v37 = vsub.f32 %v594_v19, %v1763_v30  ;;  %v660_v21 = vsub.f32 %v538_v38, %v1756_v35  ;;  %v1823_v39 = vadd.f32 %v704_v49, %v504_v51 }
 0x111   :  { %v462_v51 = vmul.f32 %v430_v62, %v430_v62  ;;  %v275_v49 = vmul.f32 %v243_v33, %v243_v33  ;;  %v475_v32 = vmul.f32 %v443_v54, %v443_v54  ;;  %v476_v56 = vmul.f32 %v444_v46, %v444_v46 }
 0x112   :  { %v692_v50 = vmul.f32 %v660_v21, %v660_v21  ;;  %1093 = vmin.xlane.f32.xlu0 %v1823_v39  ;;  %1067 = vmin.xlane.f32.xlu1 %v723_v8  ;;  %v706_v20 = vmul.f32 %v674_v37, %v674_v37  ;;  %v1211_v19 = vmin.f32 %v1788_v4, %v723_v8 }
 0x113   :  { %v598_v40 = vpop.permute.xlu1 %597  ;;  %v542_v41 = vpop.permute.xlu0 %541  ;;  %v1210_v4 = vmin.f32 %v1791_v6, %v1808_v17  ;;  %v507_v8 = vadd.f32 %v475_v32, %v275_v49  ;;  %v445_v62 = vsub.f32 %v1711_v24, %v1761_v16  ;;  %v245_v54 = vsub.f32 %v1641_v55, %v1758_v25 }
 0x114   :  { %v724_v36 = vadd.f32 %v692_v50, %v492_v44  ;;  %v675_v42 = vsub.f32 %v598_v40, %v1763_v30  ;;  %v661_v22 = vsub.f32 %v542_v41, %v1756_v35  ;;  %v1847_v15 = vadd.f32 %v706_v20, %v506_v28 }
 0x115   :  { %v494_v44 = vadd.f32 %v462_v51, %v1782_v60  ;;  %v276_v60 = vmul.f32 %v244_v5, %v244_v5  ;;  %v464_v40 = vmul.f32 %v432_v1, %v432_v1  ;;  %v433_v41 = vsub.f32 %v1689_v12, %v1729_v2 }
 0x116   :  { %v693_v43 = vmul.f32 %v661_v22, %v661_v22  ;;  %1095 = vmin.xlane.f32.xlu0 %v1834_v9  ;;  %1069 = vmin.xlane.f32.xlu1 %v724_v36  ;;  %v707_v21 = vmul.f32 %v675_v42, %v675_v42  ;;  %v1212_v50 = vmin.f32 %v1210_v4, %v724_v36 }
 0x117   :  { %v602_v38 = vpop.permute.xlu1 %601  ;;  %v546_v37 = vpop.permute.xlu0 %545  ;;  %v508_v42 = vadd.f32 %v476_v56, %v276_v60  ;;  %v446_v55 = vsub.f32 %v1713_v26, %v1761_v16  ;;  %v495_v36 = vadd.f32 %v463_v59, %v1780_v34  ;;  %v477_v22 = vmul.f32 %v445_v62, %v445_v62 }
 0x118   :  { %v725_v23 = vadd.f32 %v693_v43, %v493_v10  ;;  %v676_v33 = vsub.f32 %v602_v38, %v1763_v30  ;;  %v662_v31 = vsub.f32 %v546_v37, %v1756_v35  ;;  %v1863_v20 = vadd.f32 %v707_v21, %v507_v8 }
 0x119   :  { %v266_v46 = vmul.f32 %v234_v61, %v234_v61  ;;  %v277_v49 = vmul.f32 %v245_v54, %v245_v54  ;;  %v246_v10 = vsub.f32 %v1649_v58, %v1758_v25  ;;  %v496_v59 = vadd.f32 %v464_v40, %v1801_v52 }
 0x11a   :  { %v1858_v7 = vmin.f32 %v1211_v19, %v725_v23  ;;  %v694_v53 = vmul.f32 %v662_v31, %v662_v31  ;;  %1097 = vmin.xlane.f32.xlu0 %v1847_v15  ;;  %v708_v0 = vmul.f32 %v676_v33, %v676_v33  ;;  %1071 = vmin.xlane.f32.xlu1 %v725_v23 }
 0x11b   :  { %v606_v11 = vpop.permute.xlu1 %605  ;;  %v550_v3 = vpop.permute.xlu0 %549  ;;  %v465_v38 = vmul.f32 %v433_v41, %v433_v41  ;;  %v434_v61 = vsub.f32 %v1691_v13, %v1729_v2  ;;  %v478_v37 = vmul.f32 %v446_v55, %v446_v55  ;;  %v509_v21 = vadd.f32 %v477_v22, %v277_v49  ;;  %v2033_v22 = vld [vmem:[#allocation19_spill] sm:$0xff] }
 0x11c   :  { %v726_v6 = vadd.f32 %v694_v53, %v494_v44  ;;  %v677_v17 = vsub.f32 %v606_v11, %v1763_v30  ;;  %v663_v24 = vsub.f32 %v550_v3, %v1756_v35  ;;  %v1875_v32 = vadd.f32 %v708_v0, %v508_v42  ;;  %v2034_v49 = vld [vmem:[#allocation23_spill] sm:$0xff] }
 0x11d   :  { %v447_v58 = vsub.f32 %v1715_v27, %v1761_v16  ;;  %v237_v31 = vsub.f32 %v1617_v47, %v1731_v63  ;;  %v247_v52 = vsub.f32 %v1647_v57, %v1758_v25  ;;  %v278_v44 = vmul.f32 %v246_v10, %v246_v10 }
 0x11e   :  { %v1214_v51 = vmin.f32 %v1212_v50, %v726_v6  ;;  %v695_v28 = vmul.f32 %v663_v24, %v663_v24  ;;  %1099 = vmin.xlane.f32.xlu0 %v1863_v20  ;;  %1073 = vmin.xlane.f32.xlu1 %v726_v6  ;;  %v709_v5 = vmul.f32 %v677_v17, %v677_v17  ;;  %v2032_v6 = vld [vmem:[#allocation12_spill] sm:$0xff] }
 0x11f   :  { %v610_v12 = vpop.permute.xlu1 %609  ;;  %v554_v43 = vpop.permute.xlu0 %553  ;;  %v435_v53 = vsub.f32 %v1693_v14, %v1729_v2  ;;  %v510_v47 = vadd.f32 %v478_v37, %v278_v44  ;;  %v448_v57 = vsub.f32 %v1718_v29, %v1761_v16  ;;  %v497_v54 = vadd.f32 %v465_v38, %v1793_v18  ;;  %v2037_v44 = vld [vmem:[#allocation24_spill] sm:$0xff] }
 0x120   :  { %v727_v19 = vadd.f32 %v695_v28, %v495_v36  ;;  %v678_v26 = vsub.f32 %v610_v12, %v1763_v30  ;;  %v664_v34 = vsub.f32 %v554_v43, %v1756_v35  ;;  %v1890_v4 = vadd.f32 %v709_v5, %v509_v21 }
 0x121   :  { %v479_v60 = vmul.f32 %v447_v58, %v447_v58  ;;  %v236_v11 = vsub.f32 %v1619_v48, %v1731_v63  ;;  %v279_v3 = vmul.f32 %v247_v52, %v247_v52  ;;  %v248_v17 = vsub.f32 %v2032_v6, %v1758_v25 }
 0x122   :  { %v1215_v23 = vmin.f32 %v1858_v7, %v727_v19  ;;  %v696_v33 = vmul.f32 %v664_v34, %v664_v34  ;;  %1101 = vmin.xlane.f32.xlu0 %v1875_v32  ;;  %v710_v1 = vmul.f32 %v678_v26, %v678_v26  ;;  %1075 = vmin.xlane.f32.xlu1 %v727_v19  ;;  %v2035_v19 = vld [vmem:[#allocation11_spill] sm:$0xff] }
 0x123   :  { %v614_v13 = vpop.permute.xlu1 %613  ;;  %v558_v56 = vpop.permute.xlu0 %557  ;;  %v466_v7 = vmul.f32 %v434_v61, %v434_v61  ;;  %v467_v36 = vmul.f32 %v435_v53, %v435_v53  ;;  %v436_v48 = vsub.f32 %v2033_v22, %v1729_v2  ;;  %v511_v28 = vadd.f32 %v479_v60, %v279_v3  ;;  %v2038_v53 = vld [vmem:[#allocation14_spill] sm:$0xff] }
 0x124   :  { %v728_v8 = vadd.f32 %v696_v33, %v496_v59  ;;  %v679_v27 = vsub.f32 %v614_v13, %v1763_v30  ;;  %v665_v62 = vsub.f32 %v558_v56, %v1756_v35  ;;  %v1906_v14 = vadd.f32 %v710_v1, %v510_v47  ;;  %v2036_v33 = vld [vmem:[#allocation20_spill] sm:$0xff] }
 0x125   :  { %v498_v55 = vadd.f32 %v466_v7, %v266_v46  ;;  %v449_v10 = vsub.f32 %v2034_v49, %v1761_v16  ;;  %v269_v5 = vmul.f32 %v237_v31, %v237_v31  ;;  %v249_v26 = vsub.f32 %v2035_v19, %v1758_v25 }
 0x126   :  { %v1899_v50 = vmin.f32 %v1214_v51, %v728_v8  ;;  %v697_v0 = vmul.f32 %v665_v62, %v665_v62  ;;  %1103 = vmin.xlane.f32.xlu0 %v1890_v4  ;;  %1077 = vmin.xlane.f32.xlu1 %v728_v8  ;;  %v711_v40 = vmul.f32 %v679_v27, %v679_v27 }
 0x127   :  { %v618_v24 = vpop.permute.xlu1 %617  ;;  %v562_v29 = vpop.permute.xlu0 %561  ;;  %v480_v51 = vmul.f32 %v448_v57, %v448_v57  ;;  %v280_v34 = vmul.f32 %v248_v17, %v248_v17  ;;  %v437_v31 = vsub.f32 %v2036_v33, %v1729_v2  ;;  %v450_v1 = vsub.f32 %v2037_v44, %v1761_v16  ;;  %v2039_v17 = vld [vmem:[#allocation21_spill] sm:$0xff] }
 0x128   :  { %v729_v18 = vadd.f32 %v697_v0, %v497_v54  ;;  %v680_v41 = vsub.f32 %v618_v24, %v1763_v30  ;;  %v666_v42 = vsub.f32 %v562_v29, %v1756_v35  ;;  %v1919_v61 = vadd.f32 %v711_v40, %v511_v28  ;;  %v2040_v29 = vld [vmem:[#allocation25_spill] sm:$0xff] }
 0x129   :  { %v512_v52 = vadd.f32 %v480_v51, %v280_v34  ;;  %v468_v13 = vmul.f32 %v436_v48, %v436_v48  ;;  %v481_v56 = vmul.f32 %v449_v10, %v449_v10  ;;  %v268_v62 = vmul.f32 %v236_v11, %v236_v11  ;;  %v2042_v48 = vld [vmem:[#allocation13_spill] sm:$0xff] }
 0x12a   :  { %v1914_v12 = vmin.f32 %v1215_v23, %v729_v18  ;;  %v698_v43 = vmul.f32 %v666_v42, %v666_v42  ;;  %1105 = vmin.xlane.f32.xlu0 %v1906_v14  ;;  %v712_v46 = vmul.f32 %v680_v41, %v680_v41  ;;  %1079 = vmin.xlane.f32.xlu1 %v729_v18 }
 0x12b   :  { %v622_v59 = vpop.permute.xlu1 %621  ;;  %v566_v38 = vpop.permute.xlu0 %565  ;;  %v499_v23 = vadd.f32 %v467_v36, %v1838_v45  ;;  %v281_v7 = vmul.f32 %v249_v26, %v249_v26  ;;  %v250_v47 = vsub.f32 %v2038_v53, %v1758_v25  ;;  %v438_v24 = vsub.f32 %v2039_v17, %v1729_v2  ;;  %v2041_v36 = vld [vmem:[#allocation10_spill] sm:$0xff] }
 0x12c   :  { %v730_v37 = vadd.f32 %v698_v43, %v498_v55  ;;  %v681_v21 = vsub.f32 %v622_v59, %v1763_v30  ;;  %v667_v58 = vsub.f32 %v566_v38, %v1756_v35  ;;  %v1932_v45 = vadd.f32 %v712_v46, %v512_v52  ;;  %v2043_v46 = vld [vmem:[#allocation9_spill] sm:$0xff] }
 0x12d   :  { %v482_v11 = vmul.f32 %v450_v1, %v450_v1  ;;  %v451_v40 = vsub.f32 %v2040_v29, %v1761_v16  ;;  %v500_v18 = vadd.f32 %v468_v13, %v268_v62  ;;  %v513_v41 = vadd.f32 %v481_v56, %v281_v7  ;;  %v2045_v13 = vld [vmem:[#allocation16_spill] sm:$0xff] }
 0x12e   :  { %v1218_v8 = vmin.f32 %v1899_v50, %v730_v37  ;;  %v699_v27 = vmul.f32 %v667_v58, %v667_v58  ;;  %1107 = vmin.xlane.f32.xlu0 %v1919_v61  ;;  %1081 = vmin.xlane.f32.xlu1 %v730_v37  ;;  %v713_v60 = vmul.f32 %v681_v21, %v681_v21 }
 0x12f   :  { %v626_v57 = vpop.permute.xlu1 %625  ;;  %v570_v54 = vpop.permute.xlu0 %569  ;;  %v469_v50 = vmul.f32 %v437_v31, %v437_v31  ;;  %v238_v22 = vsub.f32 %v2041_v36, %v1731_v63  ;;  %v251_v51 = vsub.f32 %v2042_v48, %v1758_v25  ;;  %v282_v28 = vmul.f32 %v250_v47, %v250_v47 }
 0x130   :  { %v731_v0 = vadd.f32 %v699_v27, %v499_v23  ;;  %v682_v3 = vsub.f32 %v626_v57, %v1763_v30  ;;  %v668_v6 = vsub.f32 %v570_v54, %v1756_v35  ;;  %v1946_v19 = vadd.f32 %v713_v60, %v513_v41  ;;  %v2044_v23 = vld [vmem:[#allocation26_spill] sm:$0xff] }
 0x131   :  { %v239_v59 = vsub.f32 %v2043_v46, %v1731_v63  ;;  %v470_v38 = vmul.f32 %v438_v24, %v438_v24  ;;  %v514_v37 = vadd.f32 %v482_v11, %v282_v28  ;;  %v483_v21 = vmul.f32 %v451_v40, %v451_v40  ;;  %v2046_v54 = vld [vmem:[#allocation22_spill] sm:$0xff]  ;;  %v2048_v11 = vld [vmem:[#allocation15_spill] sm:$0xff] }
 0x132   :  { %v1219_v42 = vmin.f32 %v1914_v12, %v731_v0  ;;  %v700_v55 = vmul.f32 %v668_v6, %v668_v6  ;;  %1109 = vmin.xlane.f32.xlu0 %v1932_v45  ;;  %v714_v49 = vmul.f32 %v682_v3, %v682_v3  ;;  %1083 = vmin.xlane.f32.xlu1 %v731_v0  ;;  %v2047_v6 = vld [vmem:[#allocation27_spill] sm:$0xff] }
 0x133   :  { %v630_v10 = vpop.permute.xlu1 %629  ;;  %v574_v43 = vpop.permute.xlu0 %573  ;;  %v501_v58 = vadd.f32 %v469_v50, %v269_v5  ;;  %v452_v33 = vsub.f32 %v2044_v23, %v1761_v16  ;;  %v270_v44 = vmul.f32 %v238_v22, %v238_v22  ;;  %v283_v1 = vmul.f32 %v251_v51, %v251_v51 }
 0x134   :  { %v732_v26 = vadd.f32 %v700_v55, %v500_v18  ;;  %v683_v34 = vsub.f32 %v630_v10, %v1763_v30  ;;  %v669_v12 = vsub.f32 %v574_v43, %v1756_v35  ;;  %v252_v56 = vsub.f32 %v2045_v13, %v1758_v25  ;;  %v2049_v18 = vld [vmem:[#allocation18_spill] sm:$0xff]  ;;  %v2050_v55 = vld [vmem:[#allocation28_spill] sm:$0xff]  ;;  %v2051_v10 = vld [vmem:[#allocation29_spill] sm:$0xff] }
 0x135   :  { %v1959_v27 = vadd.f32 %v714_v49, %v514_v37  ;;  %v271_v47 = vmul.f32 %v239_v59, %v239_v59  ;;  %v502_v57 = vadd.f32 %v470_v38, %v270_v44  ;;  %v439_v60 = vsub.f32 %v2046_v54, %v1729_v2 }
 0x136   :  { %v1954_v31 = vmin.f32 %v1218_v8, %v732_v26  ;;  %v701_v52 = vmul.f32 %v669_v12, %v669_v12  ;;  %1111 = vmin.xlane.f32.xlu0 %v1946_v19  ;;  %1085 = vmin.xlane.f32.xlu1 %v732_v26  ;;  %v715_v7 = vmul.f32 %v683_v34, %v683_v34 }
 0x137   :  { %v634_v63 = vpop.permute.xlu1 %633  ;;  %v578_v62 = vpop.permute.xlu0 %577  ;;  %v515_v0 = vadd.f32 %v483_v21, %v283_v1  ;;  %v484_v3 = vmul.f32 %v452_v33, %v452_v33  ;;  %v453_v50 = vsub.f32 %v2047_v6, %v1761_v16  ;;  %v253_v29 = vsub.f32 %v2048_v11, %v1758_v25  ;;  %v2052_v21 = vld [vmem:[#allocation17_spill] sm:$0xff] }
 0x138   :  { %v733_v5 = vadd.f32 %v701_v52, %v501_v58  ;;  %v684_v53 = vsub.f32 %v634_v63, %v1763_v30  ;;  %v670_v8 = vsub.f32 %v578_v62, %v1756_v35  ;;  %v284_v40 = vmul.f32 %v252_v56, %v252_v56 }
 0x139   :  { %v254_v41 = vsub.f32 %v2049_v18, %v1758_v25  ;;  %v454_v36 = vsub.f32 %v2050_v55, %v1761_v16  ;;  %v747_v48 = vadd.f32 %v715_v7, %v515_v0  ;;  %v471_v49 = vmul.f32 %v439_v60, %v439_v60 }
 0x13a   :  { %v1221_v17 = vmin.f32 %v1219_v42, %v733_v5  ;;  %v702_v24 = vmul.f32 %v670_v8, %v670_v8  ;;  %1113 = vmin.xlane.f32.xlu0 %v1959_v27  ;;  %1087 = vmin.xlane.f32.xlu1 %v733_v5  ;;  %v716_v51 = vmul.f32 %v684_v53, %v684_v53 }
 0x13b   :  { %v638_v2 = vpop.permute.xlu1 %637  ;;  %v642_v22 = vpop.permute.xlu0 %641  ;;  %v455_v43 = vsub.f32 %v2051_v10, %v1761_v16  ;;  %v1231_v26 = vmin.f32 %v1823_v39, %v1847_v15  ;;  %v1232_v34 = vmin.f32 %v1834_v9, %v1863_v20  ;;  %v516_v12 = vadd.f32 %v484_v3, %v284_v40 }
 0x13c   :  { %v734_v28 = vadd.f32 %v702_v24, %v502_v57  ;;  %v685_v42 = vsub.f32 %v638_v2, %v1763_v30  ;;  %v485_v46 = vmul.f32 %v453_v50, %v453_v50  ;;  %v686_v38 = vsub.f32 %v642_v22, %v1763_v30 }
 0x13d   :  { %v285_v37 = vmul.f32 %v253_v29, %v253_v29  ;;  %v255_v58 = vsub.f32 %v2052_v21, %v1758_v25  ;;  %v1233_v23 = vmin.f32 %v1231_v26, %v1875_v32  ;;  %v1234_v16 = vmin.f32 %v1232_v34, %v1890_v4 }
 0x13e   :  { %v1222_v59 = vmin.f32 %v1954_v31, %v734_v28  ;;  %1115 = vmin.xlane.f32.xlu0 %v747_v48  ;;  %1089 = vmin.xlane.f32.xlu1 %v734_v28  ;;  %v486_v15 = vmul.f32 %v454_v36, %v454_v36  ;;  %v748_v33 = vadd.f32 %v716_v51, %v516_v12  ;;  %v1338_v2 = vmov 0.0  }
 0x13f   :  { %v582_v39 = vpop.permute.xlu1 %581  ;;  %v717_v9 = vmul.f32 %v685_v42, %v685_v42  ;;  %v286_v52 = vmul.f32 %v254_v41, %v254_v41  ;;  %v487_v31 = vmul.f32 %v455_v43, %v455_v43  ;;  %v1235_v44 = vmin.f32 %v1233_v23, %v1906_v14  ;;  %18 = vst [vmem:[#allocation4] sm:$0x1] %v1338_v2 }
 0x140   :  { %v671_v20 = vsub.f32 %v582_v39, %v1756_v35  ;;  %v1236_v1 = vmin.f32 %v1234_v16, %v1919_v61  ;;  %v503_v13 = vadd.f32 %v471_v49, %v271_v47  ;;  %v517_v56 = vadd.f32 %v485_v46, %v285_v37  ;;  %19 = vst [vmem:[#allocation4 + $0x1] sm:$0x1] %v1338_v2 }
 0x141   :  { %v718_v25 = vmul.f32 %v686_v38, %v686_v38  ;;  %v287_v32 = vmul.f32 %v255_v58, %v255_v58  ;;  %v1237_v4 = vmin.f32 %v1235_v44, %v1932_v45  ;;  %v518_v5 = vadd.f32 %v486_v15, %v286_v52  ;;  %20 = vst [vmem:[#allocation5] sm:$0x1] %v1338_v2 }
 0x142   :  { %v703_v63 = vmul.f32 %v671_v20, %v671_v20  ;;  %1117 = vmin.xlane.f32.xlu0 %v748_v33  ;;  %v1238_v62 = vmin.f32 %v1236_v1, %v1946_v19  ;;  %v749_v53 = vadd.f32 %v717_v9, %v517_v56  ;;  %21 = vst [vmem:[#allocation5 + $0x1] sm:$0x1] %v1338_v2 }
 0x143   :  { %v646_v7 = vpop.permute.xlu1 %645  ;;  %v519_v57 = vadd.f32 %v487_v31, %v287_v32  ;;  %v1239_v14 = vmin.f32 %v1237_v4, %v1959_v27  ;;  %v750_v47 = vadd.f32 %v718_v25, %v518_v5 }
 0x144   :  { %v735_v35 = vadd.f32 %v703_v63, %v503_v13  ;;  %v687_v8 = vsub.f32 %v646_v7, %v1763_v30  ;;  %v1240_v61 = vmin.f32 %v1238_v62, %v747_v48 }
 0x145   :  { %v1241_v0 = vmin.f32 %v1239_v14, %v748_v33 }
 0x146   :  { %v1223_v54 = vmin.f32 %v1221_v17, %v735_v35  ;;  %v719_v60 = vmul.f32 %v687_v8, %v687_v8  ;;  %1119 = vmin.xlane.f32.xlu0 %v749_v53  ;;  %1091 = vmin.xlane.f32.xlu1 %v735_v35  ;;  %v1242_v3 = vmin.f32 %v1240_v61, %v749_v53 }
 0x147   :  { %v1243_v19 = vmin.f32 %v1241_v0, %v750_v47 }
 0x148   :  { %v1224_v45 = vmin.f32 %v1222_v59, %v1223_v54  ;;  %v751_v6 = vadd.f32 %v719_v60, %v519_v57 }
 0x14a   :  { %v1225_v50 = vrot.slane %v1224_v45, 4  ;;  %v1244_v24 = vmin.f32 %v1242_v3, %v751_v6  ;;  %1121 = vmin.xlane.f32.xlu0 %v750_v47 }
 0x14c   :  { %v1245_v11 = vmin.f32 %v1243_v19, %v1244_v24  ;;  %v1226_v29 = vmin.f32 %v1224_v45, %v1225_v50 }
 0x14e   :  { %v1246_v30 = vrot.slane %v1245_v11, 4  ;;  %1123 = vmin.xlane.f32.xlu0 %v751_v6  ;;  %v1227_v40 = vrot.slane %v1226_v29, 2 }
 0x150   :  { %v1228_v27 = vmin.f32 %v1226_v29, %v1227_v40  ;;  %v1247_v18 = vmin.f32 %v1245_v11, %v1246_v30 }
 0x152   :  { %v1229_v41 = vrot.slane %v1228_v27, 1  ;;  %v1248_v17 = vrot.slane %v1247_v18, 2 }
 0x154   :  { %v1230_v55 = vmin.f32 %v1228_v27, %v1229_v41  ;;  %v1249_v36 = vmin.f32 %v1247_v18, %v1248_v17 }
 0x156   :  { %1254 = vadd.xlane.f32.xlu1 %v1230_v55  ;;  %v1250_v22 = vrot.slane %v1249_v36, 1 }
 0x158   :  { %v1251_v48 = vmin.f32 %v1249_v36, %v1250_v22 }
 0x15a   :  { %1256 = vadd.xlane.f32.xlu0 %v1251_v48 }
 0x197   :  { %v1064_v51 = vpop.xlane.xlu1 %1063  ;;  %v1062_v28 = vpop.xlane.xlu0 %1061 }
 0x198   :  { %v1127_v16 = vadd.f32 %v1064_v51, %v1062_v28 }
 0x19b   :  { %v1066_v42 = vpop.xlane.xlu1 %1065 }
 0x19c   :  { %v1128_v15 = vadd.f32 %v1127_v16, %v1066_v42 }
 0x19f   :  { %v1068_v49 = vpop.xlane.xlu1 %1067  ;;  %v1094_v10 = vpop.xlane.xlu0 %1093 }
 0x1a0   :  { %v1129_v9 = vadd.f32 %v1128_v15, %v1068_v49 }
 0x1a3   :  { %v1096_v43 = vpop.xlane.xlu0 %1095  ;;  %v1070_v26 = vpop.xlane.xlu1 %1069 }
 0x1a4   :  { %v1130_v52 = vadd.f32 %v1129_v9, %v1070_v26  ;;  %v1148_v44 = vadd.f32 %v1096_v43, %v1094_v10  ;;  %v1125_v10 = vld [vmem:[#allocation4] sm:$0x1] }
 0x1a7   :  { %v1098_v34 = vpop.xlane.xlu0 %1097  ;;  %v1072_v12 = vpop.xlane.xlu1 %1071 }
 0x1a8   :  { %v1131_v1 = vadd.f32 %v1130_v52, %v1072_v12  ;;  %v1149_v56 = vadd.f32 %v1148_v44, %v1098_v34  ;;  %v1252_v34 = vld [vmem:[#allocation5] sm:$0x1] }
 0x1ab   :  { %v1100_v46 = vpop.xlane.xlu0 %1099  ;;  %v1074_v59 = vpop.xlane.xlu1 %1073 }
 0x1ac   :  { %v1132_v25 = vadd.f32 %v1131_v1, %v1074_v59  ;;  %v1150_v32 = vadd.f32 %v1149_v56, %v1100_v46 }
 0x1af   :  { %v1102_v38 = vpop.xlane.xlu0 %1101  ;;  %v1076_v37 = vpop.xlane.xlu1 %1075 }
 0x1b0   :  { %v1133_v4 = vadd.f32 %v1132_v25, %v1076_v37  ;;  %v1151_v7 = vadd.f32 %v1150_v32, %v1102_v38 }
 0x1b3   :  { %v1104_v21 = vpop.xlane.xlu0 %1103  ;;  %v1078_v58 = vpop.xlane.xlu1 %1077 }
 0x1b4   :  { %v1134_v5 = vadd.f32 %v1133_v4, %v1078_v58  ;;  %v1152_v35 = vadd.f32 %v1151_v7, %v1104_v21  ;;  %v1253_v21 = vld [vmem:[#allocation5 + $0x1] sm:$0x1] }
 0x1b7   :  { %v1106_v23 = vpop.xlane.xlu0 %1105  ;;  %v1080_v39 = vpop.xlane.xlu1 %1079 }
 0x1b8   :  { %v1135_v8 = vadd.f32 %v1134_v5, %v1080_v39  ;;  %v1153_v14 = vadd.f32 %v1152_v35, %v1106_v23  ;;  %v1126_v23 = vld [vmem:[#allocation4 + $0x1] sm:$0x1] }
 0x1bb   :  { %v1108_v33 = vpop.xlane.xlu0 %1107  ;;  %v1082_v20 = vpop.xlane.xlu1 %1081 }
 0x1bc   :  { %v1136_v61 = vadd.f32 %v1135_v8, %v1082_v20  ;;  %v1154_v54 = vadd.f32 %v1153_v14, %v1108_v33  ;;  %v2053_v33 = vlaneseq }
 0x1be   :  { %v1273_v9 = vand.u32 127, %v2053_v33 }
 0x1bf   :  { %v1110_v31 = vpop.xlane.xlu0 %1109  ;;  %v1084_v13 = vpop.xlane.xlu1 %1083 }
 0x1c0   :  { %v1137_v60 = vadd.f32 %v1136_v61, %v1084_v13  ;;  %v1155_v0 = vadd.f32 %v1154_v54, %v1110_v31  ;;  %vm1275_vm0 = vcmp.eq.s32.totalorder %v1273_v9, 1  ;;  %vm1274_vm1 = vcmp.eq.s32.totalorder %v1273_v9, 0 }
 0x1c3   :  { %v1112_v63 = vpop.xlane.xlu0 %1111  ;;  %v1086_v62 = vpop.xlane.xlu1 %1085 }
 0x1c4   :  { %v1138_v3 = vadd.f32 %v1137_v60, %v1086_v62  ;;  %v1156_v19 = vadd.f32 %v1155_v0, %v1112_v63 }
 0x1c7   :  { %v1114_v53 = vpop.xlane.xlu0 %1113  ;;  %v1088_v57 = vpop.xlane.xlu1 %1087 }
 0x1c8   :  { %v1139_v50 = vadd.f32 %v1138_v3, %v1088_v57  ;;  %v1157_v24 = vadd.f32 %v1156_v19, %v1114_v53 }
 0x1cb   :  { %v1116_v47 = vpop.xlane.xlu0 %1115  ;;  %v1090_v45 = vpop.xlane.xlu1 %1089 }
 0x1cc   :  { %v1140_v11 = vadd.f32 %v1139_v50, %v1090_v45  ;;  %v1158_v40 = vadd.f32 %v1157_v24, %v1116_v47 }
 0x1cf   :  { %v1118_v6 = vpop.xlane.xlu0 %1117 }
 0x1d0   :  { %v1159_v18 = vadd.f32 %v1158_v40, %v1118_v6 }
 0x1d3   :  { %v1092_v29 = vpop.xlane.xlu1 %1091  ;;  %v1120_v30 = vpop.xlane.xlu0 %1119 }
 0x1d4   :  { %v1141_v27 = vadd.f32 %v1140_v11, %v1092_v29  ;;  %v1160_v36 = vadd.f32 %v1159_v18, %v1120_v30 }
 0x1d6   :  { %v1142_v41 = vrot.slane %v1141_v27, 4 }
 0x1d7   :  { %v1122_v17 = vpop.xlane.xlu0 %1121 }
 0x1d8   :  { %v1143_v55 = vadd.f32 %v1142_v41, %v1141_v27  ;;  %v1161_v22 = vadd.f32 %v1160_v36, %v1122_v17 }
 0x1da   :  { %v1144_v2 = vrot.slane %v1143_v55, 2 }
 0x1db   :  { %v1124_v48 = vpop.xlane.xlu0 %1123 }
 0x1dc   :  { %v1145_v51 = vadd.f32 %v1144_v2, %v1143_v55  ;;  %v1162_v28 = vadd.f32 %v1161_v22, %v1124_v48 }
 0x1de   :  { %v1146_v42 = vrot.slane %v1145_v51, 1  ;;  %v1163_v49 = vrot.slane %v1162_v28, 4 }
 0x1e0   :  { %v1147_v43 = vadd.f32 %v1146_v42, %v1145_v51  ;;  %v1164_v26 = vadd.f32 %v1163_v49, %v1162_v28 }
 0x1e2   :  { %v1169_v12 = vadd.f32 %v1147_v43, %v1125_v10  ;;  %v1165_v46 = vrot.slane %v1164_v26, 2 }
 0x1e3   :  { %v1255_v59 = vpop.xlane.xlu1 %1254 }
 0x1e4   :  { %1171 = vst [vmem:[#allocation4] sm:$0x1] %v1169_v12  ;;  %v1166_v38 = vadd.f32 %v1165_v46, %v1164_v26  ;;  %v1258_v37 = vadd.f32 %v1255_v59, %v1252_v34 }
 0x1e6   :  { %v1167_v58 = vrot.slane %v1166_v38, 1  ;;  %1260 = vst [vmem:[#allocation5] sm:$0x1] %v1258_v37 }
 0x1e7   :  { %v1257_v16 = vpop.xlane.xlu0 %1256 }
 0x1e8   :  { %v1168_v39 = vadd.f32 %v1167_v58, %v1166_v38  ;;  %v1259_v15 = vadd.f32 %v1257_v16, %v1253_v21 }
 0x1ea   :  { %v1170_v20 = vadd.f32 %v1168_v39, %v1126_v23  ;;  %1261 = vst [vmem:[#allocation5 + $0x1] sm:$0x1] %v1259_v15 }
 0x1eb   :  { %v1264_v52 = vld [vmem:[#allocation4] sm:$0x1] }
 0x1ec   :  { %1172 = vst [vmem:[#allocation4 + $0x1] sm:$0x1] %v1170_v20  ;;  %v1266_v1 = vmul.f32 0.0078125, %v1264_v52 }
 0x1ed   :  { %v1268_v31 = vld [vmem:[#allocation5] sm:$0x1] }
 0x1ee   :  { %v1270_v44 = vmul.f32 0.0078125, %v1268_v31 }
 0x1f0   :  { %v1276_v13 = vsel %vm1275_vm0, %v1270_v44, 0.0 }
 0x1f1   :  { %v1269_v56 = vld [vmem:[#allocation5 + $0x1] sm:$0x1]  ;;  %v1278_v25 = vsel %vm1274_vm1, %v1266_v1, %v1276_v13 }
 0x1f2   :  { %v1271_v63 = vmul.f32 0.0078125, %v1269_v56  ;;  %1280 = vst [vmem:[#allocation6] sm:$0x1] %v1278_v25 }
 0x1f3   :  { %v1265_v32 = vld [vmem:[#allocation4 + $0x1] sm:$0x1] }
 0x1f4   :  { %v1267_v4 = vmul.f32 0.0078125, %v1265_v32  ;;  %v1277_v62 = vsel %vm1275_vm0, %v1271_v63, 0.0 }
 0x1f6   :  { %v1279_v7 = vsel %vm1274_vm1, %v1267_v4, %v1277_v62 }
 0x1f7   :  { %1281 = vst [vmem:[#allocation6 + $0x1] sm:$0x1] %v1279_v7 }
 0x1f8   :  { %1322 = shalt.err (!%p1319_p4)
}
 0x1f9   :  { %s1323_s24 = scalar_lea.hbm %s2009_s2, 32 }
 0x1fa   :  { %p1324_p5 = scmp.ne.s32.totalorder %s2009_s2, %s1323_s24  ;;  %p1327_p6 = scmp.lt.u32.totalorder %s1323_s24, %s2009_s2 }
 0x1fc   :  { %p1329_p7 = pnand %p1327_p6, %p1324_p5 }
 0x1fe   :  { %1332 = shalt.err (!%p1329_p7)
}
 0x1ff   :  { %s1340_s29 = smov 16   ;;  %s1341_s30 = smov 1  }
 0x200   :  { %1293 = dma.vmem_to_hbm [thread:$0]  %s1288_s20, 32, %s2009_s2, [#allocation7], %s1340_s29, %s1340_s29, %s1341_s30  }
 0x201   :  { %1333 = dma.done.wait [#allocation7], 32  }
 0x202   :  { %1334 = vsyncadd [#allocation7], 4294967264 }
 0x203   :  { %1297 = vsyncpa [#allocation7], 1 }

</bundles_post_ra>
